<compile_context>
chip_gen: v6e
topology: v6e:2x2x1
jax: 0.10.0
libtpu: 0.0.40
codegen_flags: <defaults>
</compile_context>

<pallas_src>
import functools

import jax
import jax.numpy as jnp
from jax.experimental import pallas as pl
from jax.experimental.pallas import tpu as pltpu


def _cdiv(a, b):
    return -(-a // b)


def _round_up(a, b):
    return _cdiv(a, b) * b


def _tpu_vmem_capacity_bytes():
    try:
        return int(pltpu.get_tpu_info().vmem_capacity_bytes)
    except Exception:
        return 128 << 20  # v5e / v6e physical VMEM


# ---------------------------------------------------------------------------
# Fused kernel: one (bt, spatial, channel) slab per grid step.
# ---------------------------------------------------------------------------
def _se_fused_kernel(x_ref, w1t_ref, w2t_ref, o_ref, *, channels_on_lanes):
    spatial_axis = 1 if channels_on_lanes else 2
    # Squeeze: f32-accumulated global average pool straight off the block
    # (the f32 upcast dies after the reduce -- no full-block f32 copy is held).
    pooled = jnp.mean(x_ref[...].astype(jnp.float32), axis=spatial_axis)   # (bt, C)
    # Excitation: bias-free 2-layer MLP, batched over bt, f32 on the MXU.
    w1t = w1t_ref[...].astype(jnp.float32)                                 # (C, Hpad)
    w2t = w2t_ref[...].astype(jnp.float32)                                 # (Hpad, C)
    h = jnp.maximum(jnp.dot(pooled, w1t, preferred_element_type=jnp.float32), 0.0)
    y = jax.nn.sigmoid(jnp.dot(h, w2t, preferred_element_type=jnp.float32))  # (bt, C)
    # Scale: cast gate to x's dtype and re-read the block (packed bf16 multiply
    # when the I/O dtype is bf16).
    gate = y.astype(o_ref.dtype)
    gate = gate[:, None, :] if channels_on_lanes else gate[:, :, None]
    o_ref[...] = x_ref[...] * gate


# ---------------------------------------------------------------------------
# Split path (escape hatch for huge C*HW): pooled/gate kernel + scale kernel.
# ---------------------------------------------------------------------------
def _se_gate_kernel(x_ref, w1t_ref, w2t_ref, gate_ref, acc_ref, *,
                    channels_on_lanes, hw_total, chunk, needs_mask):
    s = pl.program_id(1)

    @pl.when(s == 0)
    def _():
        acc_ref[...] = jnp.zeros_like(acc_ref)

    x = x_ref[...].astype(jnp.float32)
    if needs_mask:
        if channels_on_lanes:                 # x: (1, chunk, C), spatial on sublanes
            pos = s * chunk + jax.lax.broadcasted_iota(jnp.int32, (chunk, 1), 0)
            x = jnp.where((pos < hw_total)[None], x, 0.0)
        else:                                 # x: (1, C, chunk), spatial on lanes
            pos = s * chunk + jax.lax.broadcasted_iota(jnp.int32, (1, chunk), 1)
            x = jnp.where((pos < hw_total)[None], x, 0.0)
    spatial_axis = 1 if channels_on_lanes else 2
    acc_ref[...] += jnp.sum(x, axis=spatial_axis)          # (1, C) f32 accumulator

    @pl.when(s == pl.num_programs(1) - 1)
    def _():
        pooled = acc_ref[...] * jnp.float32(1.0 / hw_total)
        w1t = w1t_ref[...].astype(jnp.float32)
        w2t = w2t_ref[...].astype(jnp.float32)
        h = jnp.maximum(jnp.dot(pooled, w1t, preferred_element_type=jnp.float32), 0.0)
        gate_ref[0] = jax.nn.sigmoid(
            jnp.dot(h, w2t, preferred_element_type=jnp.float32))


def _se_scale_kernel(x_ref, gate_ref, o_ref, *, channels_on_lanes):
    g = gate_ref[0].astype(o_ref.dtype)                    # (1, C)
    if channels_on_lanes:
        o_ref[...] = x_ref[...] * g[:, None, :]
    else:
        o_ref[...] = x_ref[...] * g[:, :, None]


# ---------------------------------------------------------------------------
# Wrapper: tiling / VMEM budgeting / path selection.
# ---------------------------------------------------------------------------
def _se_pallas(x3, w1, w2, *, channels_on_lanes, force_split=False):
    """x3: (B, HW, C) if channels_on_lanes else (B, C, HW)."""
    B = x3.shape[0]
    if channels_on_lanes:
        HW, C = x3.shape[1], x3.shape[2]
    else:
        C, HW = x3.shape[1], x3.shape[2]
    hidden = w1.shape[0]
    itemsize = jnp.dtype(x3.dtype).itemsize
    w_itemsize = jnp.dtype(w1.dtype).itemsize

    # Zero-pad the hidden dim to a full lane: both MLP matmuls use full MXU
    # tiles; padded rows/cols contribute exactly zero through ReLU/matmul.
    hid_pad = _round_up(max(hidden, 1), 128)
    w1t = jnp.zeros((C, hid_pad), w1.dtype).at[:, :hidden].set(w1.T)   # (C, Hpad)
    w2t = jnp.zeros((hid_pad, C), w2.dtype).at[:hidden, :].set(w2.T)   # (Hpad, C)
    w_bytes = 2 * C * hid_pad * w_itemsize

    # Generation-aware VMEM budget (v7x: 64 MiB phys -> ~48 usable; v5e/v6e:
    # 128 MiB -> ~96 usable) and block-size target (~8 MiB v7x, ~16 MiB v5e/v6e).
    vmem_cap = _tpu_vmem_capacity_bytes()
    usable = (vmem_cap * 3) // 4
    target_block = int(min(16 << 20, max(2 << 20, usable // 6)))

    per_img = C * HW * itemsize

    def fused_need(bt):
        blk = bt * per_img
        # double-buffered in + out blocks, transient f32 during the reduce,
        # double-buffered weights, compiler margin.
        return 4 * blk + bt * C * HW * 4 + 4 * w_bytes + (2 << 20)

    bt = max(1, min(B, target_block // max(per_img, 1)))
    if B >= 2 and _cdiv(B, bt) < 2:
        bt = _cdiv(B, 2)          # >= 2 grid steps: feed both v7x TCs, overlap DMA
    while bt > 1 and fused_need(bt) > usable:
        bt -= 1

    use_split = force_split or fused_need(bt) > usable

    if not use_split:
        grid = (_cdiv(B, bt),)    # cdiv + tail block: no divisor-of-B requirement
        blk = (bt, HW, C) if channels_on_lanes else (bt, C, HW)
        vmem_limit = int(min(max(fused_need(bt), 32 << 20), usable))
        cost = pl.CostEstimate(
            flops=2 * B * C * HW + 4 * B * C * hid_pad,
            transcendentals=B * C,
            bytes_accessed=2 * B * C * HW * itemsize + w_bytes,
        )
        kernel = functools.partial(_se_fused_kernel,
                                   channels_on_lanes=channels_on_lanes)
        return pl.pallas_call(
            kernel,
            out_shape=jax.ShapeDtypeStruct(x3.shape, x3.dtype),
            grid_spec=pltpu.PrefetchScalarGridSpec(
                num_scalar_prefetch=0,
                grid=grid,
                in_specs=[
                    pl.BlockSpec(blk, lambda b: (b, 0, 0)),        # x slab
                    pl.BlockSpec((C, hid_pad), lambda b: (0, 0)),  # resident W1^T
                    pl.BlockSpec((hid_pad, C), lambda b: (0, 0)),  # resident W2^T
                ],
                out_specs=pl.BlockSpec(blk, lambda b: (b, 0, 0)),
            ),
            compiler_params=pltpu.CompilerParams(
                dimension_semantics=("parallel",),
                vmem_limit_bytes=vmem_limit,
            ),
            cost_estimate=cost,
        )(x3, w1t, w2t)

    # ------------------ split path: chunk the spatial axis ------------------
    quantum = 8 if channels_on_lanes else 128   # sublane vs lane block quantum
    if force_split:
        chunk = 128 if not channels_on_lanes else quantum
    else:
        budget = max(usable - 4 * w_bytes - (2 << 20), quantum * C * itemsize)
        denom = C * (4 * itemsize + 4)
        chunk = max(quantum, (budget // denom // quantum) * quantum)
    chunk = int(chunk)
    if chunk >= HW:
        chunk = HW
    ns = _cdiv(HW, chunk)
    needs_mask = (HW % chunk) != 0

    if channels_on_lanes:
        x_blk = (1, chunk, C)
        x_idx = lambda b, s: (b, s, 0)
    else:
        x_blk = (1, C, chunk)
        x_idx = lambda b, s: (b, 0, s)

    split_need = 4 * C * chunk * itemsize + C * chunk * 4 + 4 * w_bytes + (2 << 20)
    vmem_limit = int(min(max(split_need, 32 << 20), usable))

    gate_kernel = functools.partial(
        _se_gate_kernel, channels_on_lanes=channels_on_lanes,
        hw_total=HW, chunk=chunk, needs_mask=needs_mask)
    gate = pl.pallas_call(
        gate_kernel,
        out_shape=jax.ShapeDtypeStruct((B, 1, C), jnp.float32),
        grid_spec=pltpu.PrefetchScalarGridSpec(
            num_scalar_prefetch=0,
            grid=(B, ns),
            in_specs=[
                pl.BlockSpec(x_blk, x_idx),
                pl.BlockSpec((C, hid_pad), lambda b, s: (0, 0)),
                pl.BlockSpec((hid_pad, C), lambda b, s: (0, 0)),
            ],
            out_specs=pl.BlockSpec((1, 1, C), lambda b, s: (b, 0, 0)),
            scratch_shapes=[pltpu.VMEM((1, C), jnp.float32)],
        ),
        compiler_params=pltpu.CompilerParams(
            dimension_semantics=("parallel", "arbitrary"),
            vmem_limit_bytes=vmem_limit,
        ),
    )(x3, w1t, w2t)

    scale_kernel = functools.partial(_se_scale_kernel,
                                     channels_on_lanes=channels_on_lanes)
    return pl.pallas_call(
        scale_kernel,
        out_shape=jax.ShapeDtypeStruct(x3.shape, x3.dtype),
        grid_spec=pltpu.PrefetchScalarGridSpec(
            num_scalar_prefetch=0,
            grid=(B, ns),
            in_specs=[
                pl.BlockSpec(x_blk, x_idx),
                pl.BlockSpec((1, 1, C), lambda b, s: (b, 0, 0)),
            ],
            out_specs=pl.BlockSpec(x_blk, x_idx),
        ),
        compiler_params=pltpu.CompilerParams(
            dimension_semantics=("parallel", "parallel"),
            vmem_limit_bytes=vmem_limit,
        ),
    )(x3, gate)


@functools.partial(jax.jit, static_argnames=("force_split",))
def se_forward(x, w1, w2, force_split=False):
    """SE forward, NCHW input.  x: (B, C, H, W); w1: (hidden, C); w2: (C, hidden).

    Keeps NCHW inside the kernel (HW on lanes): no host transposes, which would
    triple HBM traffic for this memory-bound op."""
    B, C, H, W = x.shape
    x3 = x.reshape(B, C, H * W)                       # free: merges minor dims
    out = _se_pallas(x3, w1, w2, channels_on_lanes=False, force_split=force_split)
    return out.reshape(B, C, H, W)


@functools.partial(jax.jit, static_argnames=("force_split",))
def se_forward_nhwc(x, w1, w2, force_split=False):
    """SE forward, channels-last input x: (B, H, W, C) -> lane-dense channels."""
    B, H, W, C = x.shape
    x3 = x.reshape(B, H * W, C)                       # free: merges middle dims
    out = _se_pallas(x3, w1, w2, channels_on_lanes=True, force_split=force_split)
    return out.reshape(B, H, W, C)


def se_reference(x, w1, w2):
    """Pure-JAX reference mirroring the PyTorch module (computed in f32)."""
    pooled = jnp.mean(x.astype(jnp.float32), axis=(2, 3))   # AdaptiveAvgPool2d(1)
    h = jnp.maximum(pooled @ w1.T, 0.0)                     # Linear + ReLU (no bias)
    y = jax.nn.sigmoid(h @ w2.T)                            # Linear + Sigmoid (no bias)
    return x.astype(jnp.float32) * y[:, :, None, None]


if __name__ == "__main__":
    key = jax.random.PRNGKey(0)
    kx, k1, k2, kx2 = jax.random.split(key, 4)

    # --- SE(channel=64, reduction_ratio=16) on (2, 64, 16, 16) f32, NCHW.
    B, C, H, W = 2, 64, 16, 16
    hidden = C // 16
    x = jax.random.normal(kx, (B, C, H, W), dtype=jnp.float32)
    w1 = jax.random.normal(k1, (hidden, C), dtype=jnp.float32) / jnp.sqrt(C)
    w2 = jax.random.normal(k2, (C, hidden), dtype=jnp.float32) / jnp.sqrt(hidden)

    out = jax.block_until_ready(se_forward(x, w1, w2))
    ref = se_reference(x, w1, w2)
    assert jnp.allclose(out, ref, atol=2e-5, rtol=2e-5), float(jnp.max(jnp.abs(out - ref)))

    # --- channels-last entry point (lane-dense channels, no transposes).
    x_nhwc = jnp.transpose(x, (0, 2, 3, 1))
    out_nhwc = jax.block_until_ready(se_forward_nhwc(x_nhwc, w1, w2))
    ref_nhwc = jnp.transpose(ref, (0, 2, 3, 1))
    assert jnp.allclose(out_nhwc, ref_nhwc, atol=2e-5, rtol=2e-5)

    # --- bf16 I/O (halves HBM traffic); pooling / MLP / gate stay f32.
    xb = x.astype(jnp.bfloat16)
    outb = jax.block_until_ready(se_forward(xb, w1, w2))
    refb = se_reference(xb, w1, w2)
    assert outb.dtype == jnp.bfloat16
    assert jnp.allclose(outb.astype(jnp.float32), refb, atol=5e-2, rtol=5e-2)

    # --- escape-hatch split path (chunked spatial pooling + gate, then scale),
    # exercised with HW=144 so the non-128-aligned tail mask is covered.
    B3, H3, W3 = 2, 12, 12
    xs = jax.random.normal(kx2, (B3, C, H3, W3), dtype=jnp.float32)
    out_s = jax.block_until_ready(se_forward(xs, w1, w2, force_split=True))
    ref_s = se_reference(xs, w1, w2)
    assert jnp.allclose(out_s, ref_s, atol=2e-5, rtol=2e-5), float(jnp.max(jnp.abs(out_s - ref_s)))

    print("KERNEL_OK")
</pallas_src>

<mosaic_0001>
module attributes {stable_mosaic.version = 11 : i64} {
  func.func @_se_fused_kernel(%arg0: i32, %arg1: memref<1x64x256xf32, #tpu.memory_space<vmem>>, %arg2: memref<64x128xf32, #tpu.memory_space<vmem>>, %arg3: memref<128x64xf32, #tpu.memory_space<vmem>>, %arg4: memref<1x64x256xf32, #tpu.memory_space<vmem>>) attributes {dimension_semantics = [#tpu.dimension_semantics<parallel>], iteration_bounds = array<i64: 2>, scalar_prefetch = 0 : i64, scratch_operands = 0 : i64, tpu.core_type = #tpu.core_type<tc>, window_params = [{transform_indices = @transform_0, window_bounds = array<i64: 1, 64, 256>}, {pipeline_mode = #tpu.pipeline_mode<synchronous>, transform_indices = @transform_1, window_bounds = array<i64: 64, 128>}, {pipeline_mode = #tpu.pipeline_mode<synchronous>, transform_indices = @transform_2, window_bounds = array<i64: 128, 64>}, {transform_indices = @transform_3, window_bounds = array<i64: 1, 64, 256>}]} {
    %c0 = arith.constant 0 : index
    %c0_0 = arith.constant 0 : index
    %c0_1 = arith.constant 0 : index
    %0 = vector.load %arg1[%c0, %c0_0, %c0_1] : memref<1x64x256xf32, #tpu.memory_space<vmem>>, vector<1x64x256xf32>
    %cst = arith.constant dense<0.000000e+00> : vector<1x64xf32>
    %1 = vector.multi_reduction <add>, %0, %cst [2] : vector<1x64x256xf32> to vector<1x64xf32>
    %cst_2 = arith.constant 2.560000e+02 : f32
    %2 = vector.broadcast %cst_2 : f32 to vector<1x64xf32>
    %3 = arith.divf %1, %2 : vector<1x64xf32>
    %c0_3 = arith.constant 0 : index
    %c0_4 = arith.constant 0 : index
    %4 = vector.load %arg2[%c0_3, %c0_4] : memref<64x128xf32, #tpu.memory_space<vmem>>, vector<64x128xf32>
    %c0_5 = arith.constant 0 : index
    %c0_6 = arith.constant 0 : index
    %5 = vector.load %arg3[%c0_5, %c0_6] : memref<128x64xf32, #tpu.memory_space<vmem>>, vector<128x64xf32>
    %cst_7 = arith.constant dense<0.000000e+00> : vector<1x128xf32>
    %6 = tpu.matmul %3, %4, %cst_7 {dimension_numbers = #tpu.dot_dimension_numbers<[1], [0], [0], [1], [0, 0, 1, 1], [], []>} : vector<1x64xf32>, vector<64x128xf32>, vector<1x128xf32> -> vector<1x128xf32>
    %cst_8 = arith.constant 0.000000e+00 : f32
    %7 = vector.broadcast %cst_8 : f32 to vector<1x128xf32>
    %8 = arith.maximumf %6, %7 : vector<1x128xf32>
    %cst_9 = arith.constant dense<0.000000e+00> : vector<1x64xf32>
    %9 = tpu.matmul %8, %5, %cst_9 {dimension_numbers = #tpu.dot_dimension_numbers<[1], [0], [0], [1], [0, 0, 1, 1], [], []>} : vector<1x128xf32>, vector<128x64xf32>, vector<1x64xf32> -> vector<1x64xf32>
    %10 = arith.negf %9 : vector<1x64xf32>
    %11 = math.exp %10 : vector<1x64xf32>
    %cst_10 = arith.constant 1.000000e+00 : f32
    %12 = vector.broadcast %cst_10 : f32 to vector<1x64xf32>
    %13 = arith.addf %12, %11 : vector<1x64xf32>
    %14 = arith.divf %12, %13 : vector<1x64xf32>
    %15 = vector.shape_cast %14 : vector<1x64xf32> to vector<1x64x1xf32>
    %c0_11 = arith.constant 0 : index
    %c0_12 = arith.constant 0 : index
    %c0_13 = arith.constant 0 : index
    %16 = vector.load %arg1[%c0_11, %c0_12, %c0_13] : memref<1x64x256xf32, #tpu.memory_space<vmem>>, vector<1x64x256xf32>
    %17 = vector.broadcast %15 : vector<1x64x1xf32> to vector<1x64x256xf32>
    %18 = arith.mulf %16, %17 : vector<1x64x256xf32>
    %c0_14 = arith.constant 0 : index
    %c0_15 = arith.constant 0 : index
    %c0_16 = arith.constant 0 : index
    %19 = vector.load %arg4[%c0_14, %c0_15, %c0_16] : memref<1x64x256xf32, #tpu.memory_space<vmem>>, vector<1x64x256xf32>
    tpu.vector_store %arg4[%c0_14, %c0_15, %c0_16], %18 {strides = array<i32>} : memref<1x64x256xf32, #tpu.memory_space<vmem>>, vector<1x64x256xf32>,
    return
  }
  func.func @transform_0(%arg0: i32) -> (i32, i32, i32) {
    %c0_i32 = arith.constant 0 : i32
    %c0_i32_0 = arith.constant 0 : i32
    %c0_i32_1 = arith.constant 0 : i32
    return %arg0, %c0_i32, %c0_i32_0 : i32, i32, i32
  }
  func.func @transform_1(%arg0: i32) -> (i32, i32) {
    %c0_i32 = arith.constant 0 : i32
    %c0_i32_0 = arith.constant 0 : i32
    %c0_i32_1 = arith.constant 0 : i32
    return %c0_i32, %c0_i32_0 : i32, i32
  }
  func.func @transform_2(%arg0: i32) -> (i32, i32) {
    %c0_i32 = arith.constant 0 : i32
    %c0_i32_0 = arith.constant 0 : i32
    %c0_i32_1 = arith.constant 0 : i32
    return %c0_i32, %c0_i32_0 : i32, i32
  }
  func.func @transform_3(%arg0: i32) -> (i32, i32, i32) {
    %c0_i32 = arith.constant 0 : i32
    %c0_i32_0 = arith.constant 0 : i32
    %c0_i32_1 = arith.constant 0 : i32
    return %arg0, %c0_i32, %c0_i32_0 : i32, i32, i32
  }
}

</mosaic_0001>

<bundles_post_ra>
// kernel: se_forward.1
= control target key start
LH: loop header
LB: loop body
LE: loop exit
PB: predicated region body
PF: predicated region fallthrough
CT: control target
= control target key end

     0   :  { %s718_s12 = smov 0   ;;  %s934_s0 = inlined_call_operand.vmem [shape: f32[2,64,256], index: 0, kind: input, shape index: {}]   ;;  %s935_s1 = inlined_call_operand.vmem [shape: f32[64,128], index: 1, kind: input, shape index: {}]   ;;  %s936_s2 = inlined_call_operand.vmem [shape: f32[128,64], index: 2, kind: input, shape index: {}]   ;;  %s937_s3 = inlined_call_operand.vmem [shape: f32[2,64,256], index: 3, kind: output, shape index: {}]  }
   0x1 LB: > { %s579_s13 = sadd.s32 4294967295, %s694_s12   ;;  %p583_p0 = scmp.ge.s32.totalorder %s694_s12, 1  ;;  %s694_s12 = sphi %s718_s12, %s13_s12  }
   0x2   : > { %p137_p1 = scmp.lt.s32.totalorder %s694_s12, 3 }
   0x4   : > { %p138_p2 = pnand %p583_p0, %p137_p1 }
   0x5   : > { %p161_p3 = scmp.lt.s32.totalorder (!%p138_p2), %s579_s13, 1 }
   0x6   : > { %141 = sbr.rel (%p138_p2) target bundleno = 729 (0x2d9), region = 32 }
   0xb   : > { %s939_s13 = smov (!%p161_p3, %s579_s13), 1  ;;  %v696_v24 = vmov 0.0   ;;  %v227_v25 = vld [vmem:[%s935_s1 + $0x38] sm:$0xff]  ;;  %v226_v26 = vld [vmem:[%s935_s1 + $0x30] sm:$0xff]  ;;  %v225_v27 = vld [vmem:[%s935_s1 + $0x28] sm:$0xff]  ;;  %vm697_vm0 = vmmov 0   ;;  %v252_v47 = vlaneseq }
   0xc   : > { %s592_s14 = sshll.u32 %s939_s13, 7  ;;  %620 = vmatprep.subr.mxu0 %v696_v24  ;;  %639 = vmatprep.subr.mxu1 %v696_v24  ;;  %v224_v28 = vld [vmem:[%s935_s1 + $0x20] sm:$0xff]  ;;  %v223_v29 = vld [vmem:[%s935_s1 + $0x18] sm:$0xff]  ;;  %v222_v30 = vld [vmem:[%s935_s1 + $0x10] sm:$0xff]  ;;  %vm263_vm1 = vcmask 130112   ;;  %vm270_vm2 = vcmask 195712  }
   0xd   : > { %s165_s17 = scalar_lea.vmem %s934_s0, %s592_s14  ;;  %621 = vmatpush3.msra.mxu0 %v227_v25  ;;  %v221_v31 = vld [vmem:[%s935_s1 + $0x8] sm:$0xff]  ;;  %v220_v32 = vld [vmem:[%s935_s1] sm:$0xff]  ;;  %636 = vmatprep.mubr.msk.f32.mxu0 %vm697_vm0, %v696_v24  ;;  %v243_v33 = vld [vmem:[%s936_s2 + $0x78] sm:$0xff]  ;;  %v253_v48 = vand.u32 127, %v252_v47  ;;  %v873_v49 = vshrl.u32 %v252_v47, 7  ;;  %vm277_vm3 = vcmask 261312   ;;  %s897_s20 = scalar_lea.vmem %s937_s3, %s592_s14 }
   0xe   : > { %v734_v0 = vld [vmem:[%s165_s17] sm:$0xff]  ;;  %v736_v1 = vld [vmem:[%s165_s17 + $0x8] sm:$0xff]  ;;  %v744_v5 = vld [vmem:[%s165_s17 + $0x10] sm:$0xff]  ;;  %622 = vmatprep.subr.mxu0 %v696_v24  ;;  %671 = vmatprep.mubr.msk.f32.mxu1 %vm697_vm0, %v696_v24  ;;  %vm284_vm4 = vcmask 326912   ;;  %vm291_vm5 = vcmask 392512   ;;  %vm298_vm6 = vcmask 458112  }
   0xf   : > { %v738_v2 = vld [vmem:[%s165_s17 + $0x20] sm:$0xff]  ;;  %v187_v3 = vadd.f32 %v736_v1, %v734_v0  ;;  %v742_v4 = vld [vmem:[%s165_s17 + $0x28] sm:$0xff]  ;;  %v746_v6 = vld [vmem:[%s165_s17 + $0x18] sm:$0xff]  ;;  %623 = vmatpush3.msra.mxu0 %v226_v26  ;;  %640 = vmatpush3.msra.mxu1 %v243_v33  ;;  %v258_v50 = vadd.s32 4294967288, %v253_v48  ;;  %v265_v52 = vadd.s32 4294967280, %v253_v48  ;;  %v272_v53 = vadd.s32 4294967272, %v253_v48 }
  0x10   : > { %v193_v7 = vadd.f32 %v742_v4, %v738_v2  ;;  %v750_v8 = vld [vmem:[%s165_s17 + $0x30] sm:$0xff]  ;;  %v752_v9 = vld [vmem:[%s165_s17 + $0x38] sm:$0xff]  ;;  %v190_v10 = vadd.f32 %v746_v6, %v744_v5  ;;  %v758_v12 = vld [vmem:[%s165_s17 + $0x40] sm:$0xff]  ;;  %624 = vmatprep.subr.mxu0 %v696_v24  ;;  %641 = vmatprep.subr.mxu1 %v696_v24  ;;  %v256_v55 = vsub.s32 %v253_v48, %v873_v49  ;;  %v279_v58 = vadd.s32 4294967264, %v253_v48 }
  0x11   : > { %188 = vadd.xlane.f32.xlu0 %v187_v3  ;;  %v196_v11 = vadd.f32 %v752_v9, %v750_v8  ;;  %v760_v13 = vld [vmem:[%s165_s17 + $0x48] sm:$0xff]  ;;  %v762_v14 = vld [vmem:[%s165_s17 + $0x50] sm:$0xff]  ;;  %v764_v15 = vld [vmem:[%s165_s17 + $0x58] sm:$0xff]  ;;  %625 = vmatpush3.msra.mxu0 %v225_v27  ;;  %v261_v57 = vsub.s32 %v258_v50, %v873_v49  ;;  %v268_v59 = vsub.s32 %v265_v52, %v873_v49  ;;  %v286_v63 = vadd.s32 4294967256, %v253_v48 }
  0x12   : > { %194 = vadd.xlane.f32.xlu1 %v193_v7  ;;  %v199_v16 = vadd.f32 %v760_v13, %v758_v12  ;;  %v202_v17 = vadd.f32 %v764_v15, %v762_v14  ;;  %v770_v18 = vld [vmem:[%s165_s17 + $0x60] sm:$0xff]  ;;  %v772_v19 = vld [vmem:[%s165_s17 + $0x68] sm:$0xff]  ;;  %v774_v20 = vld [vmem:[%s165_s17 + $0x70] sm:$0xff]  ;;  %626 = vmatprep.subr.mxu0 %v696_v24  ;;  %v275_v62 = vsub.s32 %v272_v53, %v873_v49  ;;  %vm305_vm7 = vcmask 523712  }
  0x13   : > { %v776_v21 = vld [vmem:[%s165_s17 + $0x78] sm:$0xff]  ;;  %v205_v22 = vadd.f32 %v772_v19, %v770_v18  ;;  %627 = vmatpush3.msra.mxu0 %v224_v28  ;;  %v242_v34 = vld [vmem:[%s936_s2 + $0x70] sm:$0xff]  ;;  %v241_v35 = vld [vmem:[%s936_s2 + $0x68] sm:$0xff]  ;;  %v289_v27 = vsub.s32 %v286_v63, %v873_v49  ;;  %v300_v28 = vadd.s32 4294967240, %v253_v48  ;;  %vm307_vm8 = vcmask 523264  }
  0x14   : > { %v208_v23 = vadd.f32 %v776_v21, %v774_v20  ;;  %628 = vmatprep.subr.mxu0 %v696_v24  ;;  %642 = vmatpush3.msra.mxu1 %v242_v34  ;;  %v240_v36 = vld [vmem:[%s936_s2 + $0x60] sm:$0xff]  ;;  %v239_v37 = vld [vmem:[%s936_s2 + $0x58] sm:$0xff]  ;;  %v238_v38 = vld [vmem:[%s936_s2 + $0x50] sm:$0xff] }
  0x15   : > { %191 = vadd.xlane.f32.xlu0 %v190_v10  ;;  %629 = vmatpush3.msra.mxu0 %v223_v29  ;;  %v237_v39 = vld [vmem:[%s936_s2 + $0x48] sm:$0xff]  ;;  %v236_v40 = vld [vmem:[%s936_s2 + $0x40] sm:$0xff]  ;;  %v235_v41 = vld [vmem:[%s936_s2 + $0x38] sm:$0xff] }
  0x16   : > { %197 = vadd.xlane.f32.xlu1 %v196_v11  ;;  %630 = vmatprep.subr.mxu0 %v696_v24  ;;  %v234_v42 = vld [vmem:[%s936_s2 + $0x30] sm:$0xff]  ;;  %v233_v43 = vld [vmem:[%s936_s2 + $0x28] sm:$0xff]  ;;  %v232_v44 = vld [vmem:[%s936_s2 + $0x20] sm:$0xff] }
  0x17   : > { %631 = vmatpush3.msra.mxu0 %v222_v30  ;;  %643 = vmatprep.subr.mxu1 %v696_v24  ;;  %v231_v45 = vld [vmem:[%s936_s2 + $0x18] sm:$0xff]  ;;  %v230_v46 = vld [vmem:[%s936_s2 + $0x10] sm:$0xff]  ;;  %v229_v50 = vld [vmem:[%s936_s2 + $0x8] sm:$0xff] }
  0x18   : > { %632 = vmatprep.subr.mxu0 %v696_v24  ;;  %644 = vmatpush3.msra.mxu1 %v241_v35 }
  0x19   : > { %200 = vadd.xlane.f32.xlu0 %v199_v16  ;;  %633 = vmatpush3.msra.mxu0 %v221_v31 }
  0x1a   : > { %203 = vadd.xlane.f32.xlu1 %v202_v17  ;;  %634 = vmatprep.subr.mxu0 %v696_v24  ;;  %v282_v17 = vsub.s32 %v279_v58, %v873_v49 }
  0x1b   : > { %635 = vmatpush3.msra.mxu0 %v220_v32  ;;  %645 = vmatprep.subr.mxu1 %v696_v24 }
  0x1c   : > { %646 = vmatpush3.msra.mxu1 %v240_v36 }
  0x1d   : > { %206 = vadd.xlane.f32.xlu0 %v205_v22  ;;  %647 = vmatprep.subr.mxu1 %v696_v24  ;;  %v293_v22 = vadd.s32 4294967248, %v253_v48 }
  0x1e   : > { %209 = vadd.xlane.f32.xlu1 %v208_v23  ;;  %648 = vmatpush3.msra.mxu1 %v239_v37 }
  0x1f   : > { %649 = vmatprep.subr.mxu1 %v696_v24  ;;  %v296_v36 = vsub.s32 %v293_v22, %v873_v49 }
  0x20   : > { %650 = vmatpush3.msra.mxu1 %v238_v38 }
  0x21   : > { %651 = vmatprep.subr.mxu1 %v696_v24 }
  0x22   : > { %652 = vmatpush3.msra.mxu1 %v237_v39  ;;  %v303_v39 = vsub.s32 %v300_v28, %v873_v49 }
  0x23   : > { %653 = vmatprep.subr.mxu1 %v696_v24 }
  0x24   : > { %654 = vmatpush3.msra.mxu1 %v236_v40 }
  0x25   : > { %655 = vmatprep.subr.mxu1 %v696_v24 }
  0x26   : > { %656 = vmatpush3.msra.mxu1 %v235_v41 }
  0x27   : > { %657 = vmatprep.subr.mxu1 %v696_v24 }
  0x28   : > { %658 = vmatpush3.msra.mxu1 %v234_v42 }
  0x29   : > { %659 = vmatprep.subr.mxu1 %v696_v24 }
  0x2a   : > { %660 = vmatpush3.msra.mxu1 %v233_v43 }
  0x2b   : > { %661 = vmatprep.subr.mxu1 %v696_v24 }
  0x2c   : > { %662 = vmatpush3.msra.mxu1 %v232_v44 }
  0x2d   : > { %663 = vmatprep.subr.mxu1 %v696_v24 }
  0x2e   : > { %664 = vmatpush3.msra.mxu1 %v231_v45 }
  0x2f   : > { %665 = vmatprep.subr.mxu1 %v696_v24 }
  0x30   : > { %666 = vmatpush3.msra.mxu1 %v230_v46 }
  0x31   : > { %667 = vmatprep.subr.mxu1 %v696_v24 }
  0x32   : > { %668 = vmatpush3.msra.mxu1 %v229_v50 }
  0x33   : > { %669 = vmatprep.subr.mxu1 %v696_v24 }
  0x9a   : > { %v189_v51 = vpop.xlane.xlu0 %188 }
  0x9b   : > { %v195_v54 = vpop.xlane.xlu1 %194  ;;  %v212_v56 = vmul.f32 0.00390625, %v189_v51  ;;  %v228_v51 = vld [vmem:[%s936_s2] sm:$0xff] }
  0x9c   : > { %v214_v60 = vmul.f32 0.00390625, %v195_v54  ;;  %670 = vmatpush3.msra.mxu1 %v228_v51 }
  0x9d   : > { %v257_v11 = vrot.slane %v212_v56, %v256_v55 }
  0x9e   : > { %v192_v61 = vpop.xlane.xlu0 %191  ;;  %v269_v23 = vrot.slane %v214_v60, %v268_v59  ;;  %v459_v60 = vsub.s32 0, %v873_v49 }
  0x9f   : > { %v213_v3 = vmul.f32 0.00390625, %v192_v61  ;;  %v198_v7 = vpop.xlane.xlu1 %197 }
  0xa0   : > { %v215_v10 = vmul.f32 0.00390625, %v198_v7 }
  0xa1   : > { %v262_v16 = vrot.slane %v213_v3, %v261_v57 }
  0xa2   : > { %v276_v25 = vrot.slane %v215_v10, %v275_v62  ;;  %v201_v26 = vpop.xlane.xlu0 %200 }
  0xa3   : > { %v264_v29 = vsel %vm263_vm1, %v262_v16, %v257_v11  ;;  %v216_v30 = vmul.f32 0.00390625, %v201_v26  ;;  %v204_v31 = vpop.xlane.xlu1 %203 }
  0xa4   : > { %v271_v32 = vsel %vm270_vm2, %v269_v23, %v264_v29  ;;  %v217_v33 = vmul.f32 0.00390625, %v204_v31 }
  0xa5   : > { %v278_v34 = vsel %vm277_vm3, %v276_v25, %v271_v32  ;;  %v283_v35 = vrot.slane %v216_v30, %v282_v17 }
  0xa6   : > { %v290_v37 = vrot.slane %v217_v33, %v289_v27  ;;  %v207_v38 = vpop.xlane.xlu0 %206 }
  0xa7   : > { %v285_v40 = vsel %vm284_vm4, %v283_v35, %v278_v34  ;;  %v218_v41 = vmul.f32 0.00390625, %v207_v38  ;;  %v210_v42 = vpop.xlane.xlu1 %209 }
  0xa8   : > { %v219_v43 = vmul.f32 0.00390625, %v210_v42  ;;  %v292_v45 = vsel %vm291_vm5, %v290_v37, %v285_v40 }
  0xa9   : > { %v297_v44 = vrot.slane %v218_v41, %v296_v36 }
  0xaa   : > { %v304_v46 = vrot.slane %v219_v43, %v303_v39 }
  0xab   : > { %v299_v47 = vsel %vm298_vm6, %v297_v44, %v292_v45 }
  0xac   : > { %v306_v48 = vsel %vm305_vm7, %v304_v46, %v299_v47 }
  0xad   : > { %637 = vmatmul.mubr.msk.f32.vlgmr.msra.gmra.mxu0 %vm307_vm8, %v306_v48 }
 0x16d   : > { %v376_v52 = vpop.f32.mrf.mxu0 }
 0x16e   : > { %v380_v53 = vmax.f32 %v376_v52, 0.0 }
 0x16f   : > { %v638_v54 = vpop.f32.mrf.mxu0 }
 0x170   : > { %672 = vmatmul.mubr.f32.vlgmr.msra.gmra.mxu1 %v380_v53 }
 0x230   : > { %v447_v55 = vpop.f32.mrf.mxu1 }
 0x231   : > { %v589_v56 = vmul.f32 -1.442695, %v447_v55 }
 0x232   : > { %v673_v57 = vpop.f32.mrf.mxu1 }
 0x233   : > { %684 = vpow2.f32 %v589_v56 }
 0x240   : > { %v685_v58 = vpop.eup %684 }
 0x241   : > { %v454_v59 = vadd.f32 1.0, %v685_v58 }
 0x243   : > { %686 = vrcp.f32 %v454_v59 }
 0x250   : > { %v687_v24 = vpop.eup %686 }
 0x251   : > { %v460_v61 = vrot.slane %v687_v24, %v459_v60 }
 0x253   : > { %466 = vbcast.lane.b32.xlu1 %v460_v61, 264  ;;  %462 = vbcast.lane.b32.xlu0 %v460_v61, 256 }
 0x257   : > { %470 = vbcast.lane.b32.xlu1 %v460_v61, 272  ;;  %478 = vbcast.lane.b32.xlu0 %v460_v61, 288 }
 0x25b   : > { %474 = vbcast.lane.b32.xlu1 %v460_v61, 280  ;;  %486 = vbcast.lane.b32.xlu0 %v460_v61, 304 }
 0x25f   : > { %482 = vbcast.lane.b32.xlu1 %v460_v61, 296 }
 0x263   : > { %490 = vbcast.lane.b32.xlu1 %v460_v61, 312 }
 0x2c5   : > { %v467_v49 = vpop.permute.xlu1 %466  ;;  %v463_v62 = vpop.permute.xlu0 %462 }
 0x2c6   : > { %v494_v63 = vmul.f32 %v467_v49, %v744_v5  ;;  %v495_v3 = vmul.f32 %v467_v49, %v746_v6  ;;  %v492_v7 = vmul.f32 %v463_v62, %v734_v0  ;;  %v493_v10 = vmul.f32 %v463_v62, %v736_v1 }
 0x2c8   : > { %510 = vst [vmem:[%s897_s20 + $0x10] sm:$0xff] %v494_v63  ;;  %511 = vst [vmem:[%s897_s20 + $0x18] sm:$0xff] %v495_v3 }
 0x2c9   : > { %508 = vst [vmem:[%s897_s20] sm:$0xff] %v492_v7  ;;  %509 = vst [vmem:[%s897_s20 + $0x8] sm:$0xff] %v493_v10  ;;  %v471_v11 = vpop.permute.xlu1 %470  ;;  %v479_v16 = vpop.permute.xlu0 %478 }
 0x2ca   : > { %v496_v17 = vmul.f32 %v471_v11, %v738_v2  ;;  %v497_v5 = vmul.f32 %v471_v11, %v742_v4  ;;  %v500_v6 = vmul.f32 %v479_v16, %v758_v12  ;;  %v501_v0 = vmul.f32 %v479_v16, %v760_v13 }
 0x2cc   : > { %512 = vst [vmem:[%s897_s20 + $0x20] sm:$0xff] %v496_v17  ;;  %513 = vst [vmem:[%s897_s20 + $0x28] sm:$0xff] %v497_v5 }
 0x2cd   : > { %516 = vst [vmem:[%s897_s20 + $0x40] sm:$0xff] %v500_v6  ;;  %517 = vst [vmem:[%s897_s20 + $0x48] sm:$0xff] %v501_v0  ;;  %v475_v1 = vpop.permute.xlu1 %474  ;;  %v487_v22 = vpop.permute.xlu0 %486 }
 0x2ce   : > { %v498_v23 = vmul.f32 %v475_v1, %v750_v8  ;;  %v499_v2 = vmul.f32 %v475_v1, %v752_v9  ;;  %v504_v4 = vmul.f32 %v487_v22, %v770_v18  ;;  %v505_v12 = vmul.f32 %v487_v22, %v772_v19 }
 0x2d0   : > { %514 = vst [vmem:[%s897_s20 + $0x30] sm:$0xff] %v498_v23  ;;  %515 = vst [vmem:[%s897_s20 + $0x38] sm:$0xff] %v499_v2 }
 0x2d1   : > { %520 = vst [vmem:[%s897_s20 + $0x60] sm:$0xff] %v504_v4  ;;  %521 = vst [vmem:[%s897_s20 + $0x68] sm:$0xff] %v505_v12  ;;  %v483_v13 = vpop.permute.xlu1 %482 }
 0x2d2   : > { %v502_v25 = vmul.f32 %v483_v13, %v762_v14  ;;  %v503_v26 = vmul.f32 %v483_v13, %v764_v15 }
 0x2d4   : > { %518 = vst [vmem:[%s897_s20 + $0x50] sm:$0xff] %v502_v25  ;;  %519 = vst [vmem:[%s897_s20 + $0x58] sm:$0xff] %v503_v26 }
 0x2d5   : > { %v491_v8 = vpop.permute.xlu1 %490 }
 0x2d6   : > { %v506_v27 = vmul.f32 %v491_v8, %v774_v20  ;;  %v507_v9 = vmul.f32 %v491_v8, %v776_v21 }
 0x2d8   : > { %522 = vst [vmem:[%s897_s20 + $0x70] sm:$0xff] %v506_v27  ;;  %523 = vst [vmem:[%s897_s20 + $0x78] sm:$0xff] %v507_v9 }
 0x2d9 PF: > { %s13_s12 = sadd.s32 1, %s694_s12  }
 0x2da   : > { %p10_p4 = scmp.ge.s32.totalorder %s13_s12, 4  }
 0x2dc   :  { %12 = sbr.rel (!%p10_p4) target bundleno = 1 (0x1), region = 62 }

</bundles_post_ra>
